<compile_context>
chip_gen: v7x
topology: tpu7x:2x2x1
jax: 0.10.0
libtpu: 0.0.40
codegen_flags: <defaults>
</compile_context>

<pallas_src>
import copy
import functools

import jax
import jax.numpy as jnp
from jax.experimental import pallas as pl
from jax.experimental.pallas import tpu as pltpu

LANE = 128


def _round_up(x, m):
    return ((x + m - 1) // m) * m


def _pad_axis(x, target, axis):
    pad = target - x.shape[axis]
    if pad <= 0:
        return x
    widths = [(0, 0)] * x.ndim
    widths[axis] = (0, pad)
    return jnp.pad(x, widths)


def _choose_tm(m):
    """Single tile for small M (no 1-step-per-core pipelines on v7x megacore);
    otherwise 512-1024 row tiles so each core gets several pipelined steps."""
    if m <= 1024:
        return _round_up(max(m, 8), 8)
    if m >= 8 * 1024:
        return 1024
    if m >= 4 * 512:
        return 512
    return 256


# -----------------------------------------------------------------------------
# Fused Pallas kernel: conv-matmul + ReLU + prev_bev add + packed bev/cls/reg
# -----------------------------------------------------------------------------
def _fused_bev_head_kernel(patches_ref, wconv_ref, bconv_ref, prev_ref,
                           wpack_ref, bpack_ref, out_ref, *, m_real, m_pad, tm):
    # Conv-as-matmul: bf16 operands -> f32 accumulation on the MXU.
    feats = jnp.dot(patches_ref[...], wconv_ref[...],
                    preferred_element_type=jnp.float32)
    # Bias + ReLU + temporal fusion in f32 (v5e has no bf16 VPU).
    feats = jnp.maximum(feats + bconv_ref[...], 0.0)
    fused = feats + prev_ref[...].astype(jnp.float32)
    # Packing matmul: identity columns pass the BEV through exactly (bf16),
    # cls/reg weights land in lanes [c_mid, c_mid+n_heads).  One lane-dense
    # 128-wide bf16 store; no in-kernel slicing/concat.
    packed = jnp.dot(fused.astype(wpack_ref.dtype), wpack_ref[...],
                     preferred_element_type=jnp.float32) + bpack_ref[...]
    if m_pad > m_real:   # static guard: keep persisted padded rows exactly zero
        row = (pl.program_id(0) * tm
               + jax.lax.broadcasted_iota(jnp.int32, packed.shape, 0))
        packed = jnp.where(row < m_real, packed, 0.0)
    out_ref[...] = packed.astype(out_ref.dtype)


def fused_bev_forward(patches, w_conv, b_conv, prev_packed, w_pack, b_pack, *,
                      tm, m_real):
    """patches:(m_pad,Kp) bf16, w_conv:(Kp,Cp) bf16, b_conv:(1,Cp) f32,
       prev_packed:(m_pad,128) bf16, w_pack:(Cp,128) bf16, b_pack:(1,128) f32
       -> packed:(m_pad,128) bf16  (cols: bev ++ cls ++ reg ++ zeros)."""
    m_pad, kp = patches.shape
    cp = w_conv.shape[1]
    np_ = w_pack.shape[1]
    assert m_pad % tm == 0, (m_pad, tm)

    flops = 2 * m_pad * kp * cp + 2 * m_pad * cp * np_
    bytes_accessed = (patches.size * patches.dtype.itemsize
                      + w_conv.size * w_conv.dtype.itemsize
                      + w_pack.size * w_pack.dtype.itemsize
                      + prev_packed.size * prev_packed.dtype.itemsize
                      + b_conv.size * 4 + b_pack.size * 4
                      + m_pad * np_ * 2)

    kernel = functools.partial(_fused_bev_head_kernel,
                               m_real=m_real, m_pad=m_pad, tm=tm)
    return pl.pallas_call(
        kernel,
        out_shape=jax.ShapeDtypeStruct((m_pad, np_), jnp.bfloat16),
        grid=(m_pad // tm,),
        in_specs=[
            pl.BlockSpec((tm, kp), lambda i: (i, 0)),     # patches    (M-tiled)
            pl.BlockSpec((kp, cp), lambda i: (0, 0)),     # conv weight (resident)
            pl.BlockSpec((1, cp), lambda i: (0, 0)),      # conv bias
            pl.BlockSpec((tm, LANE), lambda i: (i, 0)),   # prev packed (M-tiled)
            pl.BlockSpec((cp, np_), lambda i: (0, 0)),    # pack weight (resident)
            pl.BlockSpec((1, np_), lambda i: (0, 0)),     # pack bias
        ],
        out_specs=pl.BlockSpec((tm, np_), lambda i: (i, 0)),
        compiler_params=pltpu.CompilerParams(
            dimension_semantics=("parallel",),            # megacore-shardable
            vmem_limit_bytes=32 * 1024 * 1024),           # safe on v7x (64 MiB)
        cost_estimate=pl.CostEstimate(flops=flops, transcendentals=0,
                                      bytes_accessed=bytes_accessed),
    )(patches, w_conv, b_conv, prev_packed, w_pack, b_pack)


# -----------------------------------------------------------------------------
# Glue: im2col for a 3x3 / stride-1 / same-padding conv (layout plumbing only)
# -----------------------------------------------------------------------------
def im2col_3x3(x_nhwc):
    """(B, H, W, C) -> (B*H*W, 9*C) patches, ordering (kh, kw, C)."""
    B, H, W, C = x_nhwc.shape
    xp = jnp.pad(x_nhwc, ((0, 0), (1, 1), (1, 1), (0, 0)))
    cols = [xp[:, dh:dh + H, dw:dw + W, :] for dh in range(3) for dw in range(3)]
    patches = jnp.concatenate(cols, axis=-1)              # (B, H, W, 9*C)
    return patches.reshape(B * H * W, 9 * C)


# -----------------------------------------------------------------------------
# Synthetic inner "model": conv backbone + BEV bbox head, Pallas hot path
# -----------------------------------------------------------------------------
class SyntheticBEVModel:
    def __init__(self, key, c_in=4, c_mid=32, num_classes=10, bbox_dim=8):
        k1, k2, k3, k4, k5, k6 = jax.random.split(key, 6)
        self.c_in, self.c_mid = c_in, c_mid
        self.num_classes, self.bbox_dim = num_classes, bbox_dim
        self.n_heads = num_classes + bbox_dim                    # 18
        assert c_mid + self.n_heads <= LANE, "packed layout needs <= 128 cols"
        self.k_pad = _round_up(9 * c_in, LANE)                   # lane-dense K
        self.c_pad = _round_up(c_mid, LANE)                      # channels -> 128

        # Conv weight in PyTorch layout (Cout, Cin, 3, 3), flattened to match
        # the (kh, kw, Cin) ordering of im2col_3x3, padded to (128, 128).
        w_conv = jax.random.normal(k1, (c_mid, c_in, 3, 3), jnp.float32) * 0.1
        w_conv_flat = jnp.transpose(w_conv, (2, 3, 1, 0)).reshape(9 * c_in, c_mid)
        w_conv_flat = _pad_axis(_pad_axis(w_conv_flat, self.c_pad, 1), self.k_pad, 0)
        self.w_conv = w_conv_flat.astype(jnp.bfloat16)
        b_conv = jax.random.normal(k2, (c_mid,), jnp.float32) * 0.01
        self.b_conv = _pad_axis(b_conv, self.c_pad, 0).reshape(1, self.c_pad)

        # Packing head: identity pass-through for bev lanes, cls/reg weights
        # placed directly into their output lanes, rest zero.
        w_cls = jax.random.normal(k3, (c_mid, num_classes), jnp.float32) * 0.1
        b_cls = jax.random.normal(k4, (num_classes,), jnp.float32) * 0.01
        w_reg = jax.random.normal(k5, (c_mid, bbox_dim), jnp.float32) * 0.1
        b_reg = jax.random.normal(k6, (bbox_dim,), jnp.float32) * 0.01
        w_pack = jnp.zeros((self.c_pad, LANE), jnp.float32)
        w_pack = w_pack.at[jnp.arange(c_mid), jnp.arange(c_mid)].set(1.0)
        w_pack = w_pack.at[:c_mid, c_mid:c_mid + num_classes].set(w_cls)
        w_pack = w_pack.at[:c_mid, c_mid + num_classes:c_mid + self.n_heads].set(w_reg)
        self.w_pack = w_pack.astype(jnp.bfloat16)
        b_pack = jnp.zeros((1, LANE), jnp.float32)
        b_pack = b_pack.at[0, c_mid:c_mid + num_classes].set(b_cls)
        b_pack = b_pack.at[0, c_mid + num_classes:c_mid + self.n_heads].set(b_reg)
        self.b_pack = b_pack

        # mimics BEVFormer temporal state
        self.prev_frame_info = {"prev_bev": None, "scene_token": None,
                                "prev_pos": 0, "prev_angle": 0}
        self.video_test_mode = True

    def extract_feat(self, img, img_metas=None):
        """img: NCHW -> lane-dense im2col patches (bf16).  The conv matmul
        itself is fused into the head kernel so the feature map never
        round-trips HBM."""
        x_nhwc = jnp.transpose(img, (0, 2, 3, 1)).astype(jnp.float32)
        B, H, W, _ = x_nhwc.shape
        patches = im2col_3x3(x_nhwc)                       # (B*H*W, 9*Cin)
        patches = _pad_axis(patches, self.k_pad, 1)        # K -> 128, unmasked vld
        return {"patches": patches.astype(jnp.bfloat16), "B": B, "H": H, "W": W}

    def pts_bbox_head(self, feats, img_metas=None, prev_bev=None):
        patches = feats["patches"]
        B, H, W = feats["B"], feats["H"], feats["W"]
        M, L = B * H * W, H * W

        tm = _choose_tm(M)
        m_pad = _round_up(M, tm)
        patches_p = _pad_axis(patches, m_pad, 0)

        if prev_bev is None:
            prev_p = jnp.zeros((m_pad, LANE), jnp.bfloat16)
        elif prev_bev.ndim == 2 and prev_bev.shape == (m_pad, LANE):
            prev_p = prev_bev.astype(jnp.bfloat16)         # padded kernel layout
        else:
            # Fallback: user-layout (B, L, c_mid) prev -> padded packed layout.
            prev = prev_bev.reshape(M, -1).astype(jnp.float32)
            prev_p = _pad_axis(_pad_axis(prev, LANE, 1), m_pad, 0).astype(jnp.bfloat16)

        packed = fused_bev_forward(patches_p, self.w_conv, self.b_conv, prev_p,
                                   self.w_pack, self.b_pack, tm=tm, m_real=M)

        c0 = self.c_mid
        c1 = c0 + self.num_classes
        c2 = c1 + self.bbox_dim
        outs = {
            "bev_embed": packed[:M, :c0].astype(jnp.float32).reshape(B, L, self.c_mid),
            "all_cls_scores": packed[:M, c0:c1].astype(jnp.float32).reshape(
                B, L, self.num_classes),
            "all_bbox_preds": packed[:M, c1:c2].astype(jnp.float32).reshape(
                B, L, self.bbox_dim),
            # Temporal state kept in padded, packed, bf16 kernel layout so the
            # next frame feeds it straight back without a slice/re-pad pass.
            "_bev_state": packed,
        }
        return outs


# -----------------------------------------------------------------------------
# TestWrapper: same orchestration / bookkeeping semantics as the PyTorch module
# -----------------------------------------------------------------------------
class TestWrapper:
    def __init__(self, model, metadata, batch):
        self.model = model
        self.meta_data = metadata

    def simple_test_pts(self, x, img_metas, prev_bev=None, rescale=False):
        outs = self.model.pts_bbox_head(x, img_metas, prev_bev=prev_bev)
        return outs, None

    def simple_test(self, img_metas, img=None, prev_bev=None, rescale=False):
        img_feats = self.model.extract_feat(img=img, img_metas=img_metas)
        bbox_list = [dict() for _ in range(len(img_metas))]
        new_prev_bev, bbox_pts = self.simple_test_pts(
            img_feats, img_metas, prev_bev, rescale=rescale)
        return new_prev_bev, bbox_list

    def forward_test(self, img_metas, img=None, **kwargs):
        if not isinstance(img_metas, list):
            raise TypeError("img_metas must be a list, but got {}".format(type(img_metas)))
        img = [img] if img is None else img
        info = self.model.prev_frame_info
        if img_metas[0][0]["scene_token"] != info["scene_token"]:
            info["prev_bev"] = None
        info["scene_token"] = img_metas[0][0]["scene_token"]
        if not self.model.video_test_mode:
            info["prev_bev"] = None
        tmp_pos = copy.deepcopy(img_metas[0][0]["can_bus"][:3])
        tmp_angle = copy.deepcopy(img_metas[0][0]["can_bus"][-1])
        if info["prev_bev"] is not None:
            img_metas[0][0]["can_bus"][:3] = [
                a - b for a, b in zip(img_metas[0][0]["can_bus"][:3], info["prev_pos"])]
            img_metas[0][0]["can_bus"][-1] -= info["prev_angle"]
        else:
            img_metas[0][0]["can_bus"][-1] = 0
            img_metas[0][0]["can_bus"][:3] = [0, 0, 0]
        new_prev_bev, bbox_results = self.simple_test(
            img_metas[0], img[0], prev_bev=info["prev_bev"], **kwargs)
        info["prev_pos"] = tmp_pos
        info["prev_angle"] = tmp_angle
        # Persist temporal state in padded packed bf16 kernel layout.
        info["prev_bev"] = new_prev_bev.pop("_bev_state")
        return new_prev_bev  # kernel outputs (outs dict with Pallas results)

    def forward(self, batch):
        forward_input = {"img": [batch], "img_metas": self.meta_data}
        return self.forward_test(**forward_input)


if __name__ == "__main__":
    key = jax.random.PRNGKey(0)
    k_img, k_model = jax.random.split(key)

    B, C, H, W = 2, 4, 16, 16                       # NCHW PyTorch-style input
    img = jax.random.normal(k_img, (B, C, H, W), jnp.float32)

    meta = [[{"scene_token": "scene_0",
              "can_bus": [1.0] * 17 + [0.5]}]]      # 18-dim can_bus like nuScenes

    model = SyntheticBEVModel(k_model, c_in=C, c_mid=32, num_classes=10, bbox_dim=8)
    wrapper = TestWrapper(model, meta, batch=B)

    # Frame 0 (prev_bev = None path).
    outs = wrapper.forward(img)
    outs = jax.tree_util.tree_map(jax.block_until_ready, outs)

    assert outs["bev_embed"].shape == (B, H * W, 32)
    assert outs["all_cls_scores"].shape == (B, H * W, 10)
    assert outs["all_bbox_preds"].shape == (B, H * W, 8)
    assert all(bool(jnp.all(jnp.isfinite(v))) for v in outs.values())

    # Frame 1: exercises the fused prev_bev temporal path (packed bf16 state).
    outs2 = wrapper.forward(img)
    outs2 = jax.tree_util.tree_map(jax.block_until_ready, outs2)
    assert outs2["bev_embed"].shape == (B, H * W, 32)
    assert all(bool(jnp.all(jnp.isfinite(v))) for v in outs2.values())

    print("KERNEL_OK")
</pallas_src>

<mosaic_0001>
module attributes {stable_mosaic.version = 11 : i64} {
  func.func @_fused_bev_head_kernel(%arg0: i32, %arg1: memref<512x128xbf16, #tpu.memory_space<vmem>>, %arg2: memref<128x128xbf16, #tpu.memory_space<vmem>>, %arg3: memref<1x128xf32, #tpu.memory_space<vmem>>, %arg4: memref<512x128xbf16, #tpu.memory_space<vmem>>, %arg5: memref<128x128xbf16, #tpu.memory_space<vmem>>, %arg6: memref<1x128xf32, #tpu.memory_space<vmem>>, %arg7: memref<512x128xbf16, #tpu.memory_space<vmem>>) attributes {dimension_semantics = [#tpu.dimension_semantics<parallel>], iteration_bounds = array<i64: 1>, scalar_prefetch = 0 : i64, scratch_operands = 0 : i64, tpu.core_type = #tpu.core_type<tc>, window_params = [{transform_indices = @transform_0, window_bounds = array<i64: 512, 128>}, {pipeline_mode = #tpu.pipeline_mode<synchronous>, transform_indices = @transform_1, window_bounds = array<i64: 128, 128>}, {pipeline_mode = #tpu.pipeline_mode<synchronous>, transform_indices = @transform_2, window_bounds = array<i64: 1, 128>}, {transform_indices = @transform_3, window_bounds = array<i64: 512, 128>}, {pipeline_mode = #tpu.pipeline_mode<synchronous>, transform_indices = @transform_4, window_bounds = array<i64: 128, 128>}, {pipeline_mode = #tpu.pipeline_mode<synchronous>, transform_indices = @transform_5, window_bounds = array<i64: 1, 128>}, {transform_indices = @transform_6, window_bounds = array<i64: 512, 128>}]} {
    %c0 = arith.constant 0 : index
    %c0_0 = arith.constant 0 : index
    %0 = vector.load %arg1[%c0, %c0_0] : memref<512x128xbf16, #tpu.memory_space<vmem>>, vector<512x128xbf16>
    %c0_1 = arith.constant 0 : index
    %c0_2 = arith.constant 0 : index
    %1 = vector.load %arg2[%c0_1, %c0_2] : memref<128x128xbf16, #tpu.memory_space<vmem>>, vector<128x128xbf16>
    %cst = arith.constant dense<0.000000e+00> : vector<512x128xf32>
    %2 = tpu.matmul %0, %1, %cst {dimension_numbers = #tpu.dot_dimension_numbers<[1], [0], [0], [1], [0, 0, 1, 1], [], []>} : vector<512x128xbf16>, vector<128x128xbf16>, vector<512x128xf32> -> vector<512x128xf32>
    %c0_3 = arith.constant 0 : index
    %c0_4 = arith.constant 0 : index
    %3 = vector.load %arg3[%c0_3, %c0_4] : memref<1x128xf32, #tpu.memory_space<vmem>>, vector<1x128xf32>
    %4 = vector.broadcast %3 : vector<1x128xf32> to vector<512x128xf32>
    %5 = arith.addf %2, %4 : vector<512x128xf32>
    %cst_5 = arith.constant 0.000000e+00 : f32
    %6 = vector.broadcast %cst_5 : f32 to vector<512x128xf32>
    %7 = arith.maximumf %5, %6 : vector<512x128xf32>
    %c0_6 = arith.constant 0 : index
    %c0_7 = arith.constant 0 : index
    %8 = vector.load %arg4[%c0_6, %c0_7] : memref<512x128xbf16, #tpu.memory_space<vmem>>, vector<512x128xbf16>
    %9 = arith.extf %8 : vector<512x128xbf16> to vector<512x128xf32>
    %10 = arith.addf %7, %9 : vector<512x128xf32>
    %11 = arith.truncf %10 : vector<512x128xf32> to vector<512x128xbf16>
    %c0_8 = arith.constant 0 : index
    %c0_9 = arith.constant 0 : index
    %12 = vector.load %arg5[%c0_8, %c0_9] : memref<128x128xbf16, #tpu.memory_space<vmem>>, vector<128x128xbf16>
    %cst_10 = arith.constant dense<0.000000e+00> : vector<512x128xf32>
    %13 = tpu.matmul %11, %12, %cst_10 {dimension_numbers = #tpu.dot_dimension_numbers<[1], [0], [0], [1], [0, 0, 1, 1], [], []>} : vector<512x128xbf16>, vector<128x128xbf16>, vector<512x128xf32> -> vector<512x128xf32>
    %c0_11 = arith.constant 0 : index
    %c0_12 = arith.constant 0 : index
    %14 = vector.load %arg6[%c0_11, %c0_12] : memref<1x128xf32, #tpu.memory_space<vmem>>, vector<1x128xf32>
    %15 = vector.broadcast %14 : vector<1x128xf32> to vector<512x128xf32>
    %16 = arith.addf %13, %15 : vector<512x128xf32>
    %17 = arith.truncf %16 : vector<512x128xf32> to vector<512x128xbf16>
    %c0_13 = arith.constant 0 : index
    %c0_14 = arith.constant 0 : index
    %18 = vector.load %arg7[%c0_13, %c0_14] : memref<512x128xbf16, #tpu.memory_space<vmem>>, vector<512x128xbf16>
    tpu.vector_store %arg7[%c0_13, %c0_14], %17 {strides = array<i32>} : memref<512x128xbf16, #tpu.memory_space<vmem>>, vector<512x128xbf16>,
    return
  }
  func.func @transform_0(%arg0: i32) -> (i32, i32) {
    %c0_i32 = arith.constant 0 : i32
    %c0_i32_0 = arith.constant 0 : i32
    return %arg0, %c0_i32 : i32, i32
  }
  func.func @transform_1(%arg0: i32) -> (i32, i32) {
    %c0_i32 = arith.constant 0 : i32
    %c0_i32_0 = arith.constant 0 : i32
    %c0_i32_1 = arith.constant 0 : i32
    return %c0_i32, %c0_i32_0 : i32, i32
  }
  func.func @transform_2(%arg0: i32) -> (i32, i32) {
    %c0_i32 = arith.constant 0 : i32
    %c0_i32_0 = arith.constant 0 : i32
    %c0_i32_1 = arith.constant 0 : i32
    return %c0_i32, %c0_i32_0 : i32, i32
  }
  func.func @transform_3(%arg0: i32) -> (i32, i32) {
    %c0_i32 = arith.constant 0 : i32
    %c0_i32_0 = arith.constant 0 : i32
    return %arg0, %c0_i32 : i32, i32
  }
  func.func @transform_4(%arg0: i32) -> (i32, i32) {
    %c0_i32 = arith.constant 0 : i32
    %c0_i32_0 = arith.constant 0 : i32
    %c0_i32_1 = arith.constant 0 : i32
    return %c0_i32, %c0_i32_0 : i32, i32
  }
  func.func @transform_5(%arg0: i32) -> (i32, i32) {
    %c0_i32 = arith.constant 0 : i32
    %c0_i32_0 = arith.constant 0 : i32
    %c0_i32_1 = arith.constant 0 : i32
    return %c0_i32, %c0_i32_0 : i32, i32
  }
  func.func @transform_6(%arg0: i32) -> (i32, i32) {
    %c0_i32 = arith.constant 0 : i32
    %c0_i32_0 = arith.constant 0 : i32
    return %arg0, %c0_i32 : i32, i32
  }
}

</mosaic_0001>

<bundles_post_ra>
// kernel: tpu_custom_call.1
= control target key start
LH: loop header
LB: loop body
LE: loop exit
PB: predicated region body
PF: predicated region fallthrough
CT: control target
= control target key end

     0   :  { %11 = vsyncpa [#allocation3], 0  ;;  %s2893_s0 = inlined_call_operand.hbm [shape: bf16[512,128], index: 0, kind: input, shape index: {}]   ;;  %s2894_s1 = inlined_call_operand.hbm [shape: bf16[128,128], index: 1, kind: input, shape index: {}]   ;;  %s2895_s2 = inlined_call_operand.vmem [shape: f32[1,128], index: 2, kind: input, shape index: {}]   ;;  %s2896_s3 = inlined_call_operand.hbm [shape: bf16[512,128], index: 3, kind: input, shape index: {}]   ;;  %s2897_s4 = inlined_call_operand.hbm [shape: bf16[128,128], index: 4, kind: input, shape index: {}]   ;;  %s2898_s5 = inlined_call_operand.vmem [shape: f32[1,128], index: 5, kind: input, shape index: {}]   ;;  %s2899_s6 = inlined_call_operand.hbm [shape: bf16[512,128], index: 6, kind: output, shape index: {}]  }
   0x1   :  { %12 = vsyncpa [#allocation6], 0 }
   0x2   :  { %13 = vsyncpa [#allocation9], 0 }
   0x3   :  { %14 = vsyncpa [#allocation4], 0  ;;  %s2624_s21 = smov [#allocation5]   ;;  %s2625_s23 = smov [#allocation2]  }
   0x4   :  { %s32_s22 = sshll.u32 %s2624_s21, 4  ;;  %s20_s24 = sshll.u32 %s2625_s23, 4  ;;  %s33_s22 = int_to_ptr.vmem [resolvable:$true] %s32_s22  ;;  %s2666_s24 = int_to_ptr.vmem [resolvable:$true] %s20_s24 }
   0x5   :  { %s2506_s27 = scalar_lea.hbm %s2894_s1, 1024 }
   0x6   :  { %p2507_p0 = scmp.ne.s32.totalorder %s2894_s1, %s2506_s27  ;;  %p2510_p1 = scmp.lt.u32.totalorder %s2506_s27, %s2894_s1 }
   0x8   :  { %p2512_p2 = pnand %p2510_p1, %p2507_p0 }
   0xa   :  { %2515 = shalt.err (!%p2512_p2)
}
   0xb   :  { %s2516_s8 = scalar_lea.vmem %s33_s22, 1024  ;;  %p2521_p4 = scmp.lt.s32.totalorder %s33_s22, %s33_s22 }
   0xc   :  { %p2517_p3 = scmp.ne.s32.totalorder %s33_s22, %s2516_s8  ;;  %p2522_p5 = scmp.lt.s32.totalorder %s2516_s8, %s2516_s8 }
   0xe   :  { %p2523_p6 = por %p2522_p5, %p2521_p4 }
  0x10   :  { %p2524_p7 = pnand %p2523_p6, %p2517_p3 }
  0x12   :  { %2527 = shalt.err (!%p2524_p7)
}
  0x13   :  { %s2626_s9 = smov 64   ;;  %s2627_s10 = smov 4  }
  0x14   :  { %38 = dma.hbm_to_vmem [thread:$0]  %s2894_s1, 1024, %s33_s22, [#allocation6], %s2626_s9, %s2626_s9, %s2627_s10  }
  0x15   :  { %s2528_s15 = scalar_lea.hbm %s2893_s0, 4096 }
  0x16   :  { %p2529_p8 = scmp.ne.s32.totalorder %s2893_s0, %s2528_s15  ;;  %p2532_p9 = scmp.lt.u32.totalorder %s2528_s15, %s2893_s0 }
  0x18   :  { %p2534_p10 = pnand %p2532_p9, %p2529_p8 }
  0x1a   :  { %2537 = shalt.err (!%p2534_p10)
}
  0x1b   :  { %s2538_s20 = scalar_lea.vmem %s2666_s24, 4096  ;;  %p2543_p12 = scmp.lt.s32.totalorder %s2666_s24, %s2666_s24 }
  0x1c   :  { %p2539_p11 = scmp.ne.s32.totalorder %s2666_s24, %s2538_s20  ;;  %p2544_p13 = scmp.lt.s32.totalorder %s2538_s20, %s2538_s20 }
  0x1e   :  { %p2545_p0 = por %p2544_p13, %p2543_p12 }
  0x20   :  { %p2546_p1 = pnand %p2545_p0, %p2539_p11 }
  0x22   :  { %2549 = shalt.err (!%p2546_p1)
}
  0x23   :  { %26 = dma.hbm_to_vmem [thread:$0]  %s2893_s0, 4096, %s2666_s24, [#allocation3], %s2626_s9, %s2626_s9, %s2627_s10  }
  0x24   :  { %s2628_s22 = smov [#allocation7]   ;;  %s2629_s25 = smov [#allocation8]  }
  0x25   :  { %s46_s23 = sshll.u32 %s2628_s22, 4  ;;  %s58_s26 = sshll.u32 %s2629_s25, 4  ;;  %s47_s23 = int_to_ptr.vmem [resolvable:$true] %s46_s23  ;;  %s2703_s26 = int_to_ptr.vmem [resolvable:$true] %s58_s26 }
  0x26   :  { %s2550_s29 = scalar_lea.hbm %s2896_s3, 4096 }
  0x27   :  { %p2551_p2 = scmp.ne.s32.totalorder %s2896_s3, %s2550_s29  ;;  %p2554_p3 = scmp.lt.u32.totalorder %s2550_s29, %s2896_s3 }
  0x29   :  { %p2556_p4 = pnand %p2554_p3, %p2551_p2 }
  0x2b   :  { %2559 = shalt.err (!%p2556_p4)
}
  0x2c   :  { %s2560_s0 = scalar_lea.vmem %s47_s23, 4096  ;;  %p2565_p6 = scmp.lt.s32.totalorder %s47_s23, %s47_s23 }
  0x2d   :  { %p2561_p5 = scmp.ne.s32.totalorder %s47_s23, %s2560_s0  ;;  %p2566_p7 = scmp.lt.s32.totalorder %s2560_s0, %s2560_s0 }
  0x2f   :  { %p2567_p8 = por %p2566_p7, %p2565_p6 }
  0x31   :  { %p2568_p9 = pnand %p2567_p8, %p2561_p5 }
  0x33   :  { %2571 = shalt.err (!%p2568_p9)
}
  0x34   :  { %52 = dma.hbm_to_vmem [thread:$0]  %s2896_s3, 4096, %s47_s23, [#allocation6], %s2626_s9, %s2626_s9, %s2627_s10  }
  0x35   :  { %s2572_s15 = scalar_lea.hbm %s2897_s4, 1024 }
  0x36   :  { %p2573_p10 = scmp.ne.s32.totalorder %s2897_s4, %s2572_s15  ;;  %p2576_p11 = scmp.lt.u32.totalorder %s2572_s15, %s2897_s4 }
  0x38   :  { %p2578_p12 = pnand %p2576_p11, %p2573_p10 }
  0x3a   :  { %2581 = shalt.err (!%p2578_p12)
}
  0x3b   :  { %s2582_s20 = scalar_lea.vmem %s2703_s26, 1024  ;;  %p2587_p0 = scmp.lt.s32.totalorder %s2703_s26, %s2703_s26 }
  0x3c   :  { %p2583_p13 = scmp.ne.s32.totalorder %s2703_s26, %s2582_s20  ;;  %p2588_p1 = scmp.lt.s32.totalorder %s2582_s20, %s2582_s20 }
  0x3e   :  { %p2589_p2 = por %p2588_p1, %p2587_p0 }
  0x40   :  { %p2590_p3 = pnand %p2589_p2, %p2583_p13 }
  0x42   :  { %2593 = shalt.err (!%p2590_p3)
}
  0x43   :  { %64 = dma.hbm_to_vmem [thread:$0]  %s2897_s4, 1024, %s2703_s26, [#allocation9], %s2626_s9, %s2626_s9, %s2627_s10  }
  0x44   :  { %2616 = dma.done.wait [#allocation3], 4096  }
  0x45   :  { %2617 = vsyncadd [#allocation3], 4294963200 }
  0x46   :  { %2618 = dma.done.wait [#allocation6], 5120  }
  0x47   :  { %2619 = vsyncadd [#allocation6], 4294962176 }
  0x48   :  { %2620 = dma.done.wait [#allocation9], 1024  }
  0x49   :  { %2621 = vsyncadd [#allocation9], 4294966272  ;;  %v2458_v0 = vld [vmem:[#allocation5] sm:$0xff]   ;;  %v2459_v1 = vld [vmem:[#allocation5 + $0x8] sm:$0xff]  }
  0x4a   :  { %2291 = vmatprep.subr.bf16.mxu0 %v2458_v0  ;;  %v2460_v2 = vld [vmem:[#allocation5 + $0x10] sm:$0xff]   ;;  %v2461_v3 = vld [vmem:[#allocation5 + $0x18] sm:$0xff]   ;;  %v2466_v4 = vld [vmem:[#allocation2] sm:$0xff]  }
  0x4b   :  { %2292 = vmatpush3.bf16.msra.mxu0 %v2458_v0  ;;  %2307 = vmatprep.mubr.bf16.mxu0 %v2466_v4  ;;  %v2462_v5 = vld [vmem:[#allocation5 + $0x20] sm:$0xff]   ;;  %v2463_v6 = vld [vmem:[#allocation5 + $0x28] sm:$0xff]   ;;  %v2464_v7 = vld [vmem:[#allocation5 + $0x30] sm:$0xff]  }
  0x4c   :  { %2293 = vmatprep.subr.bf16.mxu0 %v2459_v1  ;;  %v2465_v8 = vld [vmem:[#allocation5 + $0x38] sm:$0xff]   ;;  %v2467_v9 = vld [vmem:[#allocation2 + $0x8] sm:$0xff]   ;;  %v2468_v10 = vld [vmem:[#allocation2 + $0x10] sm:$0xff]  }
  0x4d   :  { %v2469_v11 = vld [vmem:[#allocation2 + $0x18] sm:$0xff]   ;;  %v2470_v12 = vld [vmem:[#allocation2 + $0x20] sm:$0xff]   ;;  %v2499_v14 = vld [vmem:[#allocation8 + $0x8] sm:$0xff]  }
  0x4e   :  { %v2498_v13 = vld [vmem:[#allocation8] sm:$0xff]   ;;  %v2471_v15 = vld [vmem:[#allocation2 + $0x28] sm:$0xff]   ;;  %v2500_v16 = vld [vmem:[#allocation8 + $0x10] sm:$0xff]  }
  0x4f   :  { %2294 = vmatpush3.bf16.msra.mxu0 %v2459_v1  ;;  %2371 = vmatprep.subr.bf16.mxu1 %v2498_v13  ;;  %v2472_v17 = vld [vmem:[#allocation2 + $0x30] sm:$0xff]   ;;  %v2501_v18 = vld [vmem:[#allocation8 + $0x18] sm:$0xff]   ;;  %v2502_v19 = vld [vmem:[#allocation8 + $0x20] sm:$0xff]  }
  0x50   :  { %2295 = vmatprep.subr.bf16.mxu0 %v2460_v2  ;;  %2372 = vmatpush3.bf16.msra.mxu1 %v2498_v13  ;;  %v2473_v20 = vld [vmem:[#allocation2 + $0x38] sm:$0xff]   ;;  %v2474_v21 = vld [vmem:[#allocation2 + $0x40] sm:$0xff]   ;;  %v2475_v22 = vld [vmem:[#allocation2 + $0x48] sm:$0xff]  }
  0x51   :  { %2373 = vmatprep.subr.bf16.mxu1 %v2499_v14  ;;  %v2476_v23 = vld [vmem:[#allocation2 + $0x50] sm:$0xff]   ;;  %v2477_v24 = vld [vmem:[#allocation2 + $0x58] sm:$0xff]   ;;  %v2478_v25 = vld [vmem:[#allocation2 + $0x60] sm:$0xff]  }
  0x52   :  { %v2479_v26 = vld [vmem:[#allocation2 + $0x68] sm:$0xff]   ;;  %v2480_v27 = vld [vmem:[#allocation2 + $0x70] sm:$0xff]   ;;  %v2481_v28 = vld [vmem:[#allocation2 + $0x78] sm:$0xff]  }
  0x53   :  { %2296 = vmatpush3.bf16.msra.mxu0 %v2460_v2  ;;  %v2482_v29 = vld [vmem:[#allocation2 + $0x80] sm:$0xff]   ;;  %v2483_v30 = vld [vmem:[#allocation2 + $0x88] sm:$0xff]   ;;  %v2484_v31 = vld [vmem:[#allocation2 + $0x90] sm:$0xff]  }
  0x54   :  { %2297 = vmatprep.subr.bf16.mxu0 %v2461_v3  ;;  %2374 = vmatpush3.bf16.msra.mxu1 %v2499_v14  ;;  %v2485_v32 = vld [vmem:[#allocation2 + $0x98] sm:$0xff]   ;;  %v2486_v33 = vld [vmem:[#allocation2 + $0xa0] sm:$0xff]   ;;  %v2487_v34 = vld [vmem:[#allocation2 + $0xa8] sm:$0xff]  }
  0x55   :  { %2375 = vmatprep.subr.bf16.mxu1 %v2500_v16  ;;  %v2488_v35 = vld [vmem:[#allocation2 + $0xb0] sm:$0xff]   ;;  %v2503_v36 = vld [vmem:[#allocation8 + $0x28] sm:$0xff]   ;;  %v2489_v37 = vld [vmem:[#allocation2 + $0xb8] sm:$0xff]  }
  0x56   :  { %v2490_v38 = vld [vmem:[#allocation2 + $0xc0] sm:$0xff]   ;;  %v2504_v39 = vld [vmem:[#allocation8 + $0x30] sm:$0xff]   ;;  %v2505_v40 = vld [vmem:[#allocation8 + $0x38] sm:$0xff]  }
  0x57   :  { %2298 = vmatpush3.bf16.msra.mxu0 %v2461_v3  ;;  %v2491_v41 = vld [vmem:[#allocation2 + $0xc8] sm:$0xff]   ;;  %v2492_v42 = vld [vmem:[#allocation2 + $0xd0] sm:$0xff]   ;;  %v2493_v43 = vld [vmem:[#allocation2 + $0xd8] sm:$0xff]  }
  0x58   :  { %2299 = vmatprep.subr.bf16.mxu0 %v2462_v5  ;;  %2376 = vmatpush3.bf16.msra.mxu1 %v2500_v16  ;;  %v2494_v44 = vld [vmem:[#allocation2 + $0xe0] sm:$0xff]   ;;  %v2495_v45 = vld [vmem:[#allocation2 + $0xe8] sm:$0xff]   ;;  %v2496_v46 = vld [vmem:[#allocation2 + $0xf0] sm:$0xff]  }
  0x59   :  { %2377 = vmatprep.subr.bf16.mxu1 %v2501_v18  ;;  %v2497_v47 = vld [vmem:[#allocation2 + $0xf8] sm:$0xff]   ;;  %v2743_v48 = vld [vmem:[%s2895_s2] ss:$0 sm:$0xff]  ;;  %v2149_v50 = vld [vmem:[#allocation7 + $0x8] sm:$0xff]  }
  0x5a   :  { %v1862_v53 = vld [vmem:[#allocation7] sm:$0xff]   ;;  %v1867_v57 = vunpack.c.l.bf16 %v2149_v50  ;;  %v1868_v59 = vunpack.c.h.bf16 %v2149_v50 }
  0x5b   :  { %2300 = vmatpush3.bf16.msra.mxu0 %v2462_v5  ;;  %v1863_v63 = vunpack.c.l.bf16 %v1862_v53  ;;  %v1864_v0 = vunpack.c.h.bf16 %v1862_v53 }
  0x5c   :  { %2301 = vmatprep.subr.bf16.mxu0 %v2463_v6  ;;  %2378 = vmatpush3.bf16.msra.mxu1 %v2501_v18 }
  0x5d   :  { %2379 = vmatprep.subr.bf16.mxu1 %v2502_v19 }
  0x5f   :  { %2302 = vmatpush3.bf16.msra.mxu0 %v2463_v6  ;;  %v2151_v6 = vld [vmem:[#allocation7 + $0x18] sm:$0xff]  }
  0x60   :  { %2303 = vmatprep.subr.bf16.mxu0 %v2464_v7  ;;  %2380 = vmatpush3.bf16.msra.mxu1 %v2502_v19  ;;  %v1876_v19 = vunpack.c.h.bf16 %v2151_v6 }
  0x61   :  { %2381 = vmatprep.subr.bf16.mxu1 %v2503_v36 }
  0x63   :  { %2304 = vmatpush3.bf16.msra.mxu0 %v2464_v7 }
  0x64   :  { %2305 = vmatprep.subr.bf16.mxu0 %v2465_v8  ;;  %2382 = vmatpush3.bf16.msra.mxu1 %v2503_v36 }
  0x65   :  { %2383 = vmatprep.subr.bf16.mxu1 %v2504_v39 }
  0x67   :  { %2306 = vmatpush3.bf16.msra.mxu0 %v2465_v8 }
  0x68   :  { %2384 = vmatpush3.bf16.msra.mxu1 %v2504_v39 }
  0x69   :  { %2385 = vmatprep.subr.bf16.mxu1 %v2505_v40 }
  0x6a   :  { %2308 = vmatmul.mubr.bf16.vlgmr.msra.gmra.mrb[0].mxu0 %v2467_v9 }
  0x6b   :  { %2311 = vmatprep.mubr.bf16.mxu0 %v2468_v10 }
  0x6c   :  { %2386 = vmatpush3.bf16.msra.mxu1 %v2505_v40 }
  0x72   :  { %2312 = vmatmul.mubr.bf16.gmra.mrb[4].mxu0 %v2469_v11  ;;  %v2150_v11 = vld [vmem:[#allocation7 + $0x10] sm:$0xff]  }
  0x73   :  { %2315 = vmatprep.mubr.bf16.mxu0 %v2470_v12 }
  0x7a   :  { %2316 = vmatmul.mubr.bf16.gmra.mrb[8].mxu0 %v2471_v15 }
  0x7b   :  { %2319 = vmatprep.mubr.bf16.mxu0 %v2472_v17  ;;  %v1875_v17 = vunpack.c.l.bf16 %v2151_v6 }
  0x82   :  { %2320 = vmatmul.mubr.bf16.gmra.mrb[12].mxu0 %v2473_v20 }
  0x83   :  { %2323 = vmatprep.mubr.bf16.mxu0 %v2474_v21 }
  0x8a   :  { %2324 = vmatmul.mubr.bf16.gmra.mrb[16].mxu0 %v2475_v22  ;;  %v1871_v22 = vunpack.c.l.bf16 %v2150_v11 }
  0x8b   :  { %2327 = vmatprep.mubr.bf16.mxu0 %v2476_v23 }
  0x92   :  { %2328 = vmatmul.mubr.bf16.gmra.mrb[20].mxu0 %v2477_v24  ;;  %v1872_v24 = vunpack.c.h.bf16 %v2150_v11 }
  0x93   :  { %2331 = vmatprep.mubr.bf16.mxu0 %v2478_v25 }
  0x9a   :  { %2332 = vmatmul.mubr.bf16.gmra.mrb[24].mxu0 %v2479_v26 }
  0x9b   :  { %2335 = vmatprep.mubr.bf16.mxu0 %v2480_v27 }
  0xa2   :  { %2336 = vmatmul.mubr.bf16.gmra.mrb[28].mxu0 %v2481_v28 }
  0xa3   :  { %2339 = vmatprep.mubr.bf16.mxu0 %v2482_v29 }
  0xaa   :  { %2340 = vmatmul.mubr.bf16.gmra.mrb[32].mxu0 %v2483_v30 }
  0xab   :  { %2343 = vmatprep.mubr.bf16.mxu0 %v2484_v31 }
  0xb2   :  { %2344 = vmatmul.mubr.bf16.gmra.mrb[36].mxu0 %v2485_v32  ;;  %v2153_v32 = vld [vmem:[#allocation7 + $0x28] sm:$0xff]  }
  0xb3   :  { %2347 = vmatprep.mubr.bf16.mxu0 %v2486_v33 }
  0xba   :  { %2348 = vmatmul.mubr.bf16.gmra.mrb[40].mxu0 %v2487_v34 }
  0xbb   :  { %2351 = vmatprep.mubr.bf16.mxu0 %v2488_v35  ;;  %v2152_v35 = vld [vmem:[#allocation7 + $0x20] sm:$0xff]  }
  0xc2   :  { %2352 = vmatmul.mubr.bf16.gmra.mrb[44].mxu0 %v2489_v37 }
  0xc3   :  { %2355 = vmatprep.mubr.bf16.mxu0 %v2490_v38 }
  0xca   :  { %2356 = vmatmul.mubr.bf16.gmra.mrb[48].mxu0 %v2491_v41  ;;  %v1883_v41 = vunpack.c.l.bf16 %v2153_v32 }
  0xcb   :  { %2359 = vmatprep.mubr.bf16.mxu0 %v2492_v42 }
  0xd2   :  { %2360 = vmatmul.mubr.bf16.gmra.mrb[52].mxu0 %v2493_v43  ;;  %v1884_v43 = vunpack.c.h.bf16 %v2153_v32 }
  0xd3   :  { %2363 = vmatprep.mubr.bf16.mxu0 %v2494_v44 }
  0xda   :  { %2364 = vmatmul.mubr.bf16.gmra.mrb[56].mxu0 %v2495_v45 }
  0xdb   :  { %2367 = vmatprep.mubr.bf16.mxu0 %v2496_v46  ;;  %v1879_v46 = vunpack.c.l.bf16 %v2152_v35 }
  0xe2   :  { %2368 = vmatmul.mubr.bf16.gmra.mrb[60].mxu0 %v2497_v47 }
 0x13d   :  { %v2309_v49 = vpop.f32.mrb[0].mxu0 }
 0x13e   :  { %v450_v51 = vadd.f32 %v2309_v49, %v2743_v48  ;;  %v441_v52 = vpop.f32.mrb[1].mxu0  ;;  %v1880_v49 = vunpack.c.h.bf16 %v2152_v35 }
 0x13f   :  { %v442_v54 = vadd.f32 %v2743_v48, %v441_v52  ;;  %v2310_v55 = vpop.f32.mrb[2].mxu0 }
 0x140   :  { %v698_v56 = vmax.f32 %v450_v51, 0.0  ;;  %v453_v58 = vadd.f32 %v2310_v55, %v2743_v48  ;;  %v444_v60 = vpop.f32.mrb[3].mxu0 }
 0x141   :  { %v696_v61 = vmax.f32 %v442_v54, 0.0  ;;  %v445_v62 = vadd.f32 %v2743_v48, %v444_v60  ;;  %v2154_v60 = vld [vmem:[#allocation7 + $0x30] sm:$0xff]  }
 0x142   :  { %v699_v1 = vmax.f32 %v453_v58, 0.0  ;;  %v890_v3 = vadd.f32 %v1867_v57, %v698_v56  ;;  %v2155_v57 = vld [vmem:[#allocation7 + $0x38] sm:$0xff]  }
 0x143   :  { %v697_v2 = vmax.f32 %v445_v62, 0.0  ;;  %v888_v7 = vadd.f32 %v1863_v63, %v696_v61 }
 0x144   :  { %v891_v4 = vadd.f32 %v1868_v59, %v699_v1 }
 0x145   :  { %v2313_v5 = vpop.f32.mrb[4].mxu0  ;;  %v889_v8 = vadd.f32 %v1864_v0, %v697_v2  ;;  %v1891_v2 = vunpack.c.l.bf16 %v2155_v57 }
 0x146   :  { %v466_v9 = vadd.f32 %v2313_v5, %v2743_v48  ;;  %v457_v10 = vpop.f32.mrb[5].mxu0  ;;  %v953_v12 = vpack.c.bf16 %v891_v4, %v890_v3  ;;  %v1892_v4 = vunpack.c.h.bf16 %v2155_v57 }
 0x147   :  { %v458_v13 = vadd.f32 %v2743_v48, %v457_v10  ;;  %v2314_v14 = vpop.f32.mrb[6].mxu0  ;;  %v952_v15 = vpack.c.bf16 %v889_v8, %v888_v7  ;;  %v1887_v7 = vunpack.c.l.bf16 %v2154_v60 }
 0x148   :  { %v702_v16 = vmax.f32 %v466_v9, 0.0  ;;  %v469_v18 = vadd.f32 %v2314_v14, %v2743_v48  ;;  %v460_v20 = vpop.f32.mrb[7].mxu0  ;;  %v1888_v9 = vunpack.c.h.bf16 %v2154_v60 }
 0x149   :  { %v700_v21 = vmax.f32 %v458_v13, 0.0  ;;  %v461_v23 = vadd.f32 %v2743_v48, %v460_v20  ;;  %2387 = vmatprep.mubr.bf16.mxu1 %v952_v15  ;;  %v2156_v20 = vld [vmem:[#allocation7 + $0x40] sm:$0xff]  }
 0x14a   :  { %v703_v25 = vmax.f32 %v469_v18, 0.0  ;;  %2388 = vmatmul.mubr.bf16.vlgmr.msra.gmra.mrb[0].mxu1 %v953_v12  ;;  %v894_v27 = vadd.f32 %v1875_v17, %v702_v16  ;;  %v2157_v17 = vld [vmem:[#allocation7 + $0x48] sm:$0xff]  }
 0x14b   :  { %v701_v26 = vmax.f32 %v461_v23, 0.0  ;;  %v892_v29 = vadd.f32 %v1871_v22, %v700_v21 }
 0x14c   :  { %v895_v28 = vadd.f32 %v1876_v19, %v703_v25 }
 0x14d   :  { %v893_v30 = vadd.f32 %v1872_v24, %v701_v26  ;;  %v2317_v31 = vpop.f32.mrb[8].mxu0  ;;  %v1899_v26 = vunpack.c.l.bf16 %v2157_v17 }
 0x14e   :  { %v482_v33 = vadd.f32 %v2317_v31, %v2743_v48  ;;  %v473_v34 = vpop.f32.mrb[9].mxu0  ;;  %v955_v36 = vpack.c.bf16 %v895_v28, %v894_v27  ;;  %v1900_v28 = vunpack.c.h.bf16 %v2157_v17  ;;  %v1895_v31 = vunpack.c.l.bf16 %v2156_v20 }
 0x14f   :  { %v474_v37 = vadd.f32 %v2743_v48, %v473_v34  ;;  %v2318_v38 = vpop.f32.mrb[10].mxu0  ;;  %v954_v39 = vpack.c.bf16 %v893_v30, %v892_v29 }
 0x150   :  { %v706_v40 = vmax.f32 %v482_v33, 0.0  ;;  %v485_v42 = vadd.f32 %v2318_v38, %v2743_v48  ;;  %v476_v44 = vpop.f32.mrb[11].mxu0  ;;  %v1896_v33 = vunpack.c.h.bf16 %v2156_v20 }
 0x151   :  { %v704_v45 = vmax.f32 %v474_v37, 0.0  ;;  %v477_v47 = vadd.f32 %v2743_v48, %v476_v44  ;;  %2391 = vmatprep.mubr.bf16.mxu1 %v954_v39  ;;  %v2158_v44 = vld [vmem:[#allocation7 + $0x50] sm:$0xff]  }
 0x152   :  { %v707_v50 = vmax.f32 %v485_v42, 0.0  ;;  %2392 = vmatmul.mubr.bf16.gmra.mrb[4].mxu1 %v955_v36  ;;  %v898_v52 = vadd.f32 %v1883_v41, %v706_v40  ;;  %v2159_v41 = vld [vmem:[#allocation7 + $0x58] sm:$0xff]  }
 0x153   :  { %v705_v51 = vmax.f32 %v477_v47, 0.0  ;;  %v896_v54 = vadd.f32 %v1879_v46, %v704_v45 }
 0x154   :  { %v899_v53 = vadd.f32 %v1884_v43, %v707_v50 }
 0x155   :  { %v897_v55 = vadd.f32 %v1880_v49, %v705_v51  ;;  %v2321_v56 = vpop.f32.mrb[12].mxu0  ;;  %v1907_v51 = vunpack.c.l.bf16 %v2159_v41 }
 0x156   :  { %v498_v58 = vadd.f32 %v2321_v56, %v2743_v48  ;;  %v489_v59 = vpop.f32.mrb[13].mxu0  ;;  %v957_v61 = vpack.c.bf16 %v899_v53, %v898_v52  ;;  %v1908_v53 = vunpack.c.h.bf16 %v2159_v41  ;;  %v1903_v56 = vunpack.c.l.bf16 %v2158_v44 }
 0x157   :  { %v490_v62 = vadd.f32 %v2743_v48, %v489_v59  ;;  %v2322_v63 = vpop.f32.mrb[14].mxu0  ;;  %v956_v0 = vpack.c.bf16 %v897_v55, %v896_v54 }
 0x158   :  { %v710_v1 = vmax.f32 %v498_v58, 0.0  ;;  %v501_v3 = vadd.f32 %v2322_v63, %v2743_v48  ;;  %v492_v5 = vpop.f32.mrb[15].mxu0  ;;  %v1904_v58 = vunpack.c.h.bf16 %v2158_v44 }
 0x159   :  { %v708_v6 = vmax.f32 %v490_v62, 0.0  ;;  %v493_v8 = vadd.f32 %v2743_v48, %v492_v5  ;;  %2395 = vmatprep.mubr.bf16.mxu1 %v956_v0  ;;  %v2160_v5 = vld [vmem:[#allocation7 + $0x60] sm:$0xff]  }
 0x15a   :  { %v711_v10 = vmax.f32 %v501_v3, 0.0  ;;  %2396 = vmatmul.mubr.bf16.gmra.mrb[8].mxu1 %v957_v61  ;;  %v902_v12 = vadd.f32 %v1891_v2, %v710_v1  ;;  %v2161_v2 = vld [vmem:[#allocation7 + $0x68] sm:$0xff]  }
 0x15b   :  { %v709_v11 = vmax.f32 %v493_v8, 0.0  ;;  %v900_v14 = vadd.f32 %v1887_v7, %v708_v6 }
 0x15c   :  { %v903_v13 = vadd.f32 %v1892_v4, %v711_v10 }
 0x15d   :  { %v901_v15 = vadd.f32 %v1888_v9, %v709_v11  ;;  %v2325_v16 = vpop.f32.mrb[16].mxu0  ;;  %v1915_v11 = vunpack.c.l.bf16 %v2161_v2 }
 0x15e   :  { %v514_v18 = vadd.f32 %v2325_v16, %v2743_v48  ;;  %v505_v19 = vpop.f32.mrb[17].mxu0  ;;  %v959_v21 = vpack.c.bf16 %v903_v13, %v902_v12  ;;  %v1916_v13 = vunpack.c.h.bf16 %v2161_v2  ;;  %v1911_v16 = vunpack.c.l.bf16 %v2160_v5 }
 0x15f   :  { %v506_v22 = vadd.f32 %v2743_v48, %v505_v19  ;;  %v2326_v23 = vpop.f32.mrb[18].mxu0  ;;  %v958_v24 = vpack.c.bf16 %v901_v15, %v900_v14 }
 0x160   :  { %v714_v25 = vmax.f32 %v514_v18, 0.0  ;;  %v517_v27 = vadd.f32 %v2326_v23, %v2743_v48  ;;  %v508_v29 = vpop.f32.mrb[19].mxu0  ;;  %v1912_v18 = vunpack.c.h.bf16 %v2160_v5 }
 0x161   :  { %v712_v30 = vmax.f32 %v506_v22, 0.0  ;;  %v509_v32 = vadd.f32 %v2743_v48, %v508_v29  ;;  %2399 = vmatprep.mubr.bf16.mxu1 %v958_v24  ;;  %v2162_v29 = vld [vmem:[#allocation7 + $0x70] sm:$0xff]  }
 0x162   :  { %v715_v34 = vmax.f32 %v517_v27, 0.0  ;;  %2400 = vmatmul.mubr.bf16.gmra.mrb[12].mxu1 %v959_v21  ;;  %v906_v36 = vadd.f32 %v1899_v26, %v714_v25  ;;  %v2163_v26 = vld [vmem:[#allocation7 + $0x78] sm:$0xff]  }
 0x163   :  { %v713_v35 = vmax.f32 %v509_v32, 0.0  ;;  %v904_v38 = vadd.f32 %v1895_v31, %v712_v30 }
 0x164   :  { %v907_v37 = vadd.f32 %v1900_v28, %v715_v34 }
 0x165   :  { %v905_v39 = vadd.f32 %v1896_v33, %v713_v35  ;;  %v2329_v40 = vpop.f32.mrb[20].mxu0  ;;  %v1923_v35 = vunpack.c.l.bf16 %v2163_v26 }
 0x166   :  { %v530_v42 = vadd.f32 %v2329_v40, %v2743_v48  ;;  %v521_v43 = vpop.f32.mrb[21].mxu0  ;;  %v961_v45 = vpack.c.bf16 %v907_v37, %v906_v36  ;;  %v1924_v37 = vunpack.c.h.bf16 %v2163_v26  ;;  %v1919_v40 = vunpack.c.l.bf16 %v2162_v29 }
 0x167   :  { %v522_v46 = vadd.f32 %v2743_v48, %v521_v43  ;;  %v2330_v47 = vpop.f32.mrb[22].mxu0  ;;  %v960_v49 = vpack.c.bf16 %v905_v39, %v904_v38 }
 0x168   :  { %v718_v50 = vmax.f32 %v530_v42, 0.0  ;;  %v533_v52 = vadd.f32 %v2330_v47, %v2743_v48  ;;  %v524_v54 = vpop.f32.mrb[23].mxu0  ;;  %v1920_v42 = vunpack.c.h.bf16 %v2162_v29 }
 0x169   :  { %v716_v55 = vmax.f32 %v522_v46, 0.0  ;;  %v525_v57 = vadd.f32 %v2743_v48, %v524_v54  ;;  %2403 = vmatprep.mubr.bf16.mxu1 %v960_v49  ;;  %v2164_v54 = vld [vmem:[#allocation7 + $0x80] sm:$0xff]  }
 0x16a   :  { %v719_v59 = vmax.f32 %v533_v52, 0.0  ;;  %2404 = vmatmul.mubr.bf16.gmra.mrb[16].mxu1 %v961_v45  ;;  %v910_v61 = vadd.f32 %v1907_v51, %v718_v50  ;;  %v2165_v51 = vld [vmem:[#allocation7 + $0x88] sm:$0xff]  }
 0x16b   :  { %v717_v60 = vmax.f32 %v525_v57, 0.0  ;;  %v908_v63 = vadd.f32 %v1903_v56, %v716_v55 }
 0x16c   :  { %v911_v62 = vadd.f32 %v1908_v53, %v719_v59 }
 0x16d   :  { %v909_v0 = vadd.f32 %v1904_v58, %v717_v60  ;;  %v2333_v1 = vpop.f32.mrb[24].mxu0  ;;  %v1931_v60 = vunpack.c.l.bf16 %v2165_v51 }
 0x16e   :  { %v546_v3 = vadd.f32 %v2333_v1, %v2743_v48  ;;  %v537_v4 = vpop.f32.mrb[25].mxu0  ;;  %v963_v6 = vpack.c.bf16 %v911_v62, %v910_v61  ;;  %v1932_v62 = vunpack.c.h.bf16 %v2165_v51  ;;  %v1927_v1 = vunpack.c.l.bf16 %v2164_v54 }
 0x16f   :  { %v538_v7 = vadd.f32 %v2743_v48, %v537_v4  ;;  %v2334_v8 = vpop.f32.mrb[26].mxu0  ;;  %v962_v9 = vpack.c.bf16 %v909_v0, %v908_v63 }
 0x170   :  { %v722_v10 = vmax.f32 %v546_v3, 0.0  ;;  %v549_v12 = vadd.f32 %v2334_v8, %v2743_v48  ;;  %v540_v14 = vpop.f32.mrb[27].mxu0  ;;  %v1928_v3 = vunpack.c.h.bf16 %v2164_v54 }
 0x171   :  { %v720_v15 = vmax.f32 %v538_v7, 0.0  ;;  %v541_v17 = vadd.f32 %v2743_v48, %v540_v14  ;;  %2407 = vmatprep.mubr.bf16.mxu1 %v962_v9  ;;  %v2166_v14 = vld [vmem:[#allocation7 + $0x90] sm:$0xff]  }
 0x172   :  { %v723_v19 = vmax.f32 %v549_v12, 0.0  ;;  %2408 = vmatmul.mubr.bf16.gmra.mrb[20].mxu1 %v963_v6  ;;  %v914_v21 = vadd.f32 %v1915_v11, %v722_v10  ;;  %v2167_v11 = vld [vmem:[#allocation7 + $0x98] sm:$0xff]  }
 0x173   :  { %v721_v20 = vmax.f32 %v541_v17, 0.0  ;;  %v912_v23 = vadd.f32 %v1911_v16, %v720_v15 }
 0x174   :  { %v915_v22 = vadd.f32 %v1916_v13, %v723_v19 }
 0x175   :  { %v913_v24 = vadd.f32 %v1912_v18, %v721_v20  ;;  %v2337_v25 = vpop.f32.mrb[28].mxu0  ;;  %v1939_v20 = vunpack.c.l.bf16 %v2167_v11 }
 0x176   :  { %v562_v27 = vadd.f32 %v2337_v25, %v2743_v48  ;;  %v553_v28 = vpop.f32.mrb[29].mxu0  ;;  %v965_v30 = vpack.c.bf16 %v915_v22, %v914_v21  ;;  %v1940_v22 = vunpack.c.h.bf16 %v2167_v11  ;;  %v1935_v25 = vunpack.c.l.bf16 %v2166_v14 }
 0x177   :  { %v554_v31 = vadd.f32 %v2743_v48, %v553_v28  ;;  %v2338_v32 = vpop.f32.mrb[30].mxu0  ;;  %v964_v33 = vpack.c.bf16 %v913_v24, %v912_v23 }
 0x178   :  { %v726_v34 = vmax.f32 %v562_v27, 0.0  ;;  %v565_v36 = vadd.f32 %v2338_v32, %v2743_v48  ;;  %v556_v38 = vpop.f32.mrb[31].mxu0  ;;  %v1936_v27 = vunpack.c.h.bf16 %v2166_v14 }
 0x179   :  { %v724_v39 = vmax.f32 %v554_v31, 0.0  ;;  %v557_v41 = vadd.f32 %v2743_v48, %v556_v38  ;;  %2411 = vmatprep.mubr.bf16.mxu1 %v964_v33  ;;  %v2168_v38 = vld [vmem:[#allocation7 + $0xa0] sm:$0xff]  }
 0x17a   :  { %v727_v43 = vmax.f32 %v565_v36, 0.0  ;;  %2412 = vmatmul.mubr.bf16.gmra.mrb[24].mxu1 %v965_v30  ;;  %v918_v45 = vadd.f32 %v1923_v35, %v726_v34  ;;  %v2169_v35 = vld [vmem:[#allocation7 + $0xa8] sm:$0xff]  }
 0x17b   :  { %v725_v44 = vmax.f32 %v557_v41, 0.0  ;;  %v916_v47 = vadd.f32 %v1919_v40, %v724_v39 }
 0x17c   :  { %v919_v46 = vadd.f32 %v1924_v37, %v727_v43 }
 0x17d   :  { %v917_v49 = vadd.f32 %v1920_v42, %v725_v44  ;;  %v2341_v50 = vpop.f32.mrb[32].mxu0  ;;  %v1947_v44 = vunpack.c.l.bf16 %v2169_v35 }
 0x17e   :  { %v578_v52 = vadd.f32 %v2341_v50, %v2743_v48  ;;  %v569_v53 = vpop.f32.mrb[33].mxu0  ;;  %v967_v55 = vpack.c.bf16 %v919_v46, %v918_v45  ;;  %v1948_v46 = vunpack.c.h.bf16 %v2169_v35  ;;  %v1943_v50 = vunpack.c.l.bf16 %v2168_v38 }
 0x17f   :  { %v570_v56 = vadd.f32 %v2743_v48, %v569_v53  ;;  %v2342_v57 = vpop.f32.mrb[34].mxu0  ;;  %v966_v58 = vpack.c.bf16 %v917_v49, %v916_v47 }
 0x180   :  { %v730_v59 = vmax.f32 %v578_v52, 0.0  ;;  %v581_v61 = vadd.f32 %v2342_v57, %v2743_v48  ;;  %v572_v63 = vpop.f32.mrb[35].mxu0  ;;  %v1944_v52 = vunpack.c.h.bf16 %v2168_v38 }
 0x181   :  { %v728_v0 = vmax.f32 %v570_v56, 0.0  ;;  %v573_v2 = vadd.f32 %v2743_v48, %v572_v63  ;;  %2415 = vmatprep.mubr.bf16.mxu1 %v966_v58  ;;  %v2170_v63 = vld [vmem:[#allocation7 + $0xb0] sm:$0xff]  }
 0x182   :  { %v731_v4 = vmax.f32 %v581_v61, 0.0  ;;  %2416 = vmatmul.mubr.bf16.gmra.mrb[28].mxu1 %v967_v55  ;;  %v922_v6 = vadd.f32 %v1931_v60, %v730_v59  ;;  %v2171_v60 = vld [vmem:[#allocation7 + $0xb8] sm:$0xff]  }
 0x183   :  { %v729_v5 = vmax.f32 %v573_v2, 0.0  ;;  %v920_v8 = vadd.f32 %v1927_v1, %v728_v0 }
 0x184   :  { %v923_v7 = vadd.f32 %v1932_v62, %v731_v4 }
 0x185   :  { %v921_v9 = vadd.f32 %v1928_v3, %v729_v5  ;;  %v2345_v10 = vpop.f32.mrb[36].mxu0  ;;  %v1955_v5 = vunpack.c.l.bf16 %v2171_v60 }
 0x186   :  { %v594_v12 = vadd.f32 %v2345_v10, %v2743_v48  ;;  %v585_v13 = vpop.f32.mrb[37].mxu0  ;;  %v969_v15 = vpack.c.bf16 %v923_v7, %v922_v6  ;;  %v1956_v7 = vunpack.c.h.bf16 %v2171_v60  ;;  %v1951_v10 = vunpack.c.l.bf16 %v2170_v63 }
 0x187   :  { %v586_v16 = vadd.f32 %v2743_v48, %v585_v13  ;;  %v2346_v17 = vpop.f32.mrb[38].mxu0  ;;  %v968_v18 = vpack.c.bf16 %v921_v9, %v920_v8 }
 0x188   :  { %v734_v19 = vmax.f32 %v594_v12, 0.0  ;;  %v597_v21 = vadd.f32 %v2346_v17, %v2743_v48  ;;  %v588_v23 = vpop.f32.mrb[39].mxu0  ;;  %v1952_v12 = vunpack.c.h.bf16 %v2170_v63 }
 0x189   :  { %v732_v24 = vmax.f32 %v586_v16, 0.0  ;;  %v589_v26 = vadd.f32 %v2743_v48, %v588_v23  ;;  %2419 = vmatprep.mubr.bf16.mxu1 %v968_v18  ;;  %v2172_v23 = vld [vmem:[#allocation7 + $0xc0] sm:$0xff]  }
 0x18a   :  { %v735_v28 = vmax.f32 %v597_v21, 0.0  ;;  %2420 = vmatmul.mubr.bf16.gmra.mrb[32].mxu1 %v969_v15  ;;  %v926_v30 = vadd.f32 %v1939_v20, %v734_v19  ;;  %v2173_v20 = vld [vmem:[#allocation7 + $0xc8] sm:$0xff]  }
 0x18b   :  { %v733_v29 = vmax.f32 %v589_v26, 0.0  ;;  %v924_v32 = vadd.f32 %v1935_v25, %v732_v24 }
 0x18c   :  { %v927_v31 = vadd.f32 %v1940_v22, %v735_v28 }
 0x18d   :  { %v925_v33 = vadd.f32 %v1936_v27, %v733_v29  ;;  %v2349_v34 = vpop.f32.mrb[40].mxu0  ;;  %v1963_v29 = vunpack.c.l.bf16 %v2173_v20 }
 0x18e   :  { %v610_v36 = vadd.f32 %v2349_v34, %v2743_v48  ;;  %v601_v37 = vpop.f32.mrb[41].mxu0  ;;  %v971_v39 = vpack.c.bf16 %v927_v31, %v926_v30  ;;  %v1964_v31 = vunpack.c.h.bf16 %v2173_v20  ;;  %v1959_v34 = vunpack.c.l.bf16 %v2172_v23 }
 0x18f   :  { %v602_v40 = vadd.f32 %v2743_v48, %v601_v37  ;;  %v2350_v41 = vpop.f32.mrb[42].mxu0  ;;  %v970_v42 = vpack.c.bf16 %v925_v33, %v924_v32 }
 0x190   :  { %v738_v43 = vmax.f32 %v610_v36, 0.0  ;;  %v613_v45 = vadd.f32 %v2350_v41, %v2743_v48  ;;  %v604_v47 = vpop.f32.mrb[43].mxu0  ;;  %v1960_v36 = vunpack.c.h.bf16 %v2172_v23 }
 0x191   :  { %v736_v49 = vmax.f32 %v602_v40, 0.0  ;;  %v605_v51 = vadd.f32 %v2743_v48, %v604_v47  ;;  %2423 = vmatprep.mubr.bf16.mxu1 %v970_v42  ;;  %v2174_v47 = vld [vmem:[#allocation7 + $0xd0] sm:$0xff]  }
 0x192   :  { %v739_v53 = vmax.f32 %v613_v45, 0.0  ;;  %2424 = vmatmul.mubr.bf16.gmra.mrb[36].mxu1 %v971_v39  ;;  %v930_v55 = vadd.f32 %v1947_v44, %v738_v43  ;;  %v2175_v44 = vld [vmem:[#allocation7 + $0xd8] sm:$0xff]  }
 0x193   :  { %v737_v54 = vmax.f32 %v605_v51, 0.0  ;;  %v928_v57 = vadd.f32 %v1943_v50, %v736_v49 }
 0x194   :  { %v931_v56 = vadd.f32 %v1948_v46, %v739_v53 }
 0x195   :  { %v929_v58 = vadd.f32 %v1944_v52, %v737_v54  ;;  %v2353_v59 = vpop.f32.mrb[44].mxu0  ;;  %v1971_v54 = vunpack.c.l.bf16 %v2175_v44 }
 0x196   :  { %v626_v61 = vadd.f32 %v2353_v59, %v2743_v48  ;;  %v617_v62 = vpop.f32.mrb[45].mxu0  ;;  %v973_v0 = vpack.c.bf16 %v931_v56, %v930_v55  ;;  %v1972_v56 = vunpack.c.h.bf16 %v2175_v44  ;;  %v1967_v59 = vunpack.c.l.bf16 %v2174_v47 }
 0x197   :  { %v618_v1 = vadd.f32 %v2743_v48, %v617_v62  ;;  %v2354_v2 = vpop.f32.mrb[46].mxu0  ;;  %v972_v3 = vpack.c.bf16 %v929_v58, %v928_v57 }
 0x198   :  { %v742_v4 = vmax.f32 %v626_v61, 0.0  ;;  %v629_v6 = vadd.f32 %v2354_v2, %v2743_v48  ;;  %v620_v8 = vpop.f32.mrb[47].mxu0  ;;  %v1968_v61 = vunpack.c.h.bf16 %v2174_v47 }
 0x199   :  { %v740_v9 = vmax.f32 %v618_v1, 0.0  ;;  %v621_v11 = vadd.f32 %v2743_v48, %v620_v8  ;;  %2427 = vmatprep.mubr.bf16.mxu1 %v972_v3  ;;  %v2176_v8 = vld [vmem:[#allocation7 + $0xe0] sm:$0xff]  }
 0x19a   :  { %v743_v13 = vmax.f32 %v629_v6, 0.0  ;;  %2428 = vmatmul.mubr.bf16.gmra.mrb[40].mxu1 %v973_v0  ;;  %v934_v15 = vadd.f32 %v1955_v5, %v742_v4  ;;  %v2177_v5 = vld [vmem:[#allocation7 + $0xe8] sm:$0xff]  }
 0x19b   :  { %v741_v14 = vmax.f32 %v621_v11, 0.0  ;;  %v932_v17 = vadd.f32 %v1951_v10, %v740_v9 }
 0x19c   :  { %v935_v16 = vadd.f32 %v1956_v7, %v743_v13 }
 0x19d   :  { %v933_v18 = vadd.f32 %v1952_v12, %v741_v14  ;;  %v2357_v19 = vpop.f32.mrb[48].mxu0  ;;  %v1979_v14 = vunpack.c.l.bf16 %v2177_v5 }
 0x19e   :  { %v642_v21 = vadd.f32 %v2357_v19, %v2743_v48  ;;  %v633_v22 = vpop.f32.mrb[49].mxu0  ;;  %v975_v24 = vpack.c.bf16 %v935_v16, %v934_v15  ;;  %v1980_v16 = vunpack.c.h.bf16 %v2177_v5  ;;  %v1975_v19 = vunpack.c.l.bf16 %v2176_v8 }
 0x19f   :  { %v634_v25 = vadd.f32 %v2743_v48, %v633_v22  ;;  %v2358_v26 = vpop.f32.mrb[50].mxu0  ;;  %v974_v27 = vpack.c.bf16 %v933_v18, %v932_v17 }
 0x1a0   :  { %v746_v28 = vmax.f32 %v642_v21, 0.0  ;;  %v645_v30 = vadd.f32 %v2358_v26, %v2743_v48  ;;  %v636_v32 = vpop.f32.mrb[51].mxu0  ;;  %v1976_v21 = vunpack.c.h.bf16 %v2176_v8 }
 0x1a1   :  { %v744_v33 = vmax.f32 %v634_v25, 0.0  ;;  %v637_v35 = vadd.f32 %v2743_v48, %v636_v32  ;;  %2431 = vmatprep.mubr.bf16.mxu1 %v974_v27  ;;  %v2178_v32 = vld [vmem:[#allocation7 + $0xf0] sm:$0xff]  }
 0x1a2   :  { %v747_v37 = vmax.f32 %v645_v30, 0.0  ;;  %2432 = vmatmul.mubr.bf16.gmra.mrb[44].mxu1 %v975_v24  ;;  %v938_v39 = vadd.f32 %v1963_v29, %v746_v28  ;;  %v2179_v29 = vld [vmem:[#allocation7 + $0xf8] sm:$0xff]  }
 0x1a3   :  { %v745_v38 = vmax.f32 %v637_v35, 0.0  ;;  %v936_v41 = vadd.f32 %v1959_v34, %v744_v33 }
 0x1a4   :  { %v939_v40 = vadd.f32 %v1964_v31, %v747_v37 }
 0x1a5   :  { %v937_v42 = vadd.f32 %v1960_v36, %v745_v38  ;;  %v2361_v43 = vpop.f32.mrb[52].mxu0  ;;  %v1987_v38 = vunpack.c.l.bf16 %v2179_v29 }
 0x1a6   :  { %v658_v45 = vadd.f32 %v2361_v43, %v2743_v48  ;;  %v649_v46 = vpop.f32.mrb[53].mxu0  ;;  %v977_v49 = vpack.c.bf16 %v939_v40, %v938_v39  ;;  %v1988_v40 = vunpack.c.h.bf16 %v2179_v29  ;;  %v1983_v43 = vunpack.c.l.bf16 %v2178_v32 }
 0x1a7   :  { %v650_v50 = vadd.f32 %v2743_v48, %v649_v46  ;;  %v2362_v51 = vpop.f32.mrb[54].mxu0  ;;  %v976_v52 = vpack.c.bf16 %v937_v42, %v936_v41 }
 0x1a8   :  { %v750_v53 = vmax.f32 %v658_v45, 0.0  ;;  %v661_v55 = vadd.f32 %v2362_v51, %v2743_v48  ;;  %v652_v57 = vpop.f32.mrb[55].mxu0  ;;  %v1984_v45 = vunpack.c.h.bf16 %v2178_v32 }
 0x1a9   :  { %v748_v58 = vmax.f32 %v650_v50, 0.0  ;;  %v653_v60 = vadd.f32 %v2743_v48, %v652_v57  ;;  %2435 = vmatprep.mubr.bf16.mxu1 %v976_v52 }
 0x1aa   :  { %v751_v62 = vmax.f32 %v661_v55, 0.0  ;;  %2436 = vmatmul.mubr.bf16.gmra.mrb[48].mxu1 %v977_v49  ;;  %v942_v0 = vadd.f32 %v1971_v54, %v750_v53 }
 0x1ab   :  { %v749_v63 = vmax.f32 %v653_v60, 0.0  ;;  %v940_v2 = vadd.f32 %v1967_v59, %v748_v58 }
 0x1ac   :  { %v943_v1 = vadd.f32 %v1972_v56, %v751_v62  ;;  %v2812_v56 = vld [vmem:[%s2898_s5] ss:$0 sm:$0xff]  ;;  %s2630_s5 = smov [#allocation10]  }
 0x1ad   :  { %v941_v3 = vadd.f32 %v1968_v61, %v749_v63  ;;  %v2365_v4 = vpop.f32.mrb[56].mxu0  ;;  %s1669_s23 = sshll.u32 %s2630_s5, 4  ;;  %s1670_s23 = int_to_ptr.vmem [resolvable:$true] %s1669_s23 }
 0x1ae   :  { %v674_v6 = vadd.f32 %v2365_v4, %v2743_v48  ;;  %v665_v7 = vpop.f32.mrb[57].mxu0  ;;  %v979_v9 = vpack.c.bf16 %v943_v1, %v942_v0  ;;  %s2594_s25 = scalar_lea.vmem %s1670_s23, 4096  ;;  %p2599_p5 = scmp.lt.s32.totalorder %s1670_s23, %s1670_s23 }
 0x1af   :  { %v666_v10 = vadd.f32 %v2743_v48, %v665_v7  ;;  %v2366_v11 = vpop.f32.mrb[58].mxu0  ;;  %v978_v12 = vpack.c.bf16 %v941_v3, %v940_v2  ;;  %p2595_p4 = scmp.ne.s32.totalorder %s1670_s23, %s2594_s25  ;;  %p2600_p6 = scmp.lt.s32.totalorder %s2594_s25, %s2594_s25 }
 0x1b0   :  { %v754_v13 = vmax.f32 %v674_v6, 0.0  ;;  %v677_v15 = vadd.f32 %v2366_v11, %v2743_v48  ;;  %v668_v17 = vpop.f32.mrb[59].mxu0 }
 0x1b1   :  { %v752_v18 = vmax.f32 %v666_v10, 0.0  ;;  %v669_v20 = vadd.f32 %v2743_v48, %v668_v17  ;;  %2439 = vmatprep.mubr.bf16.mxu1 %v978_v12  ;;  %p2601_p7 = por %p2600_p6, %p2599_p5 }
 0x1b2   :  { %v755_v22 = vmax.f32 %v677_v15, 0.0  ;;  %2440 = vmatmul.mubr.bf16.gmra.mrb[52].mxu1 %v979_v9  ;;  %v946_v24 = vadd.f32 %v1979_v14, %v754_v13 }
 0x1b3   :  { %v753_v23 = vmax.f32 %v669_v20, 0.0  ;;  %v944_v26 = vadd.f32 %v1975_v19, %v752_v18  ;;  %p2602_p8 = pnand %p2601_p7, %p2595_p4 }
 0x1b4   :  { %v947_v25 = vadd.f32 %v1980_v16, %v755_v22 }
 0x1b5   :  { %v945_v27 = vadd.f32 %v1976_v21, %v753_v23  ;;  %v2369_v28 = vpop.f32.mrb[60].mxu0 }
 0x1b6   :  { %v690_v30 = vadd.f32 %v2369_v28, %v2743_v48  ;;  %v681_v31 = vpop.f32.mrb[61].mxu0  ;;  %v981_v33 = vpack.c.bf16 %v947_v25, %v946_v24 }
 0x1b7   :  { %v682_v34 = vadd.f32 %v2743_v48, %v681_v31  ;;  %v2370_v35 = vpop.f32.mrb[62].mxu0  ;;  %v980_v36 = vpack.c.bf16 %v945_v27, %v944_v26 }
 0x1b8   :  { %v758_v37 = vmax.f32 %v690_v30, 0.0  ;;  %v693_v39 = vadd.f32 %v2370_v35, %v2743_v48  ;;  %v684_v41 = vpop.f32.mrb[63].mxu0 }
 0x1b9   :  { %v756_v42 = vmax.f32 %v682_v34, 0.0  ;;  %v685_v44 = vadd.f32 %v2743_v48, %v684_v41  ;;  %2443 = vmatprep.mubr.bf16.mxu1 %v980_v36 }
 0x1ba   :  { %v759_v46 = vmax.f32 %v693_v39, 0.0  ;;  %2444 = vmatmul.mubr.bf16.gmra.mrb[56].mxu1 %v981_v33  ;;  %v950_v49 = vadd.f32 %v1987_v38, %v758_v37 }
 0x1bb   :  { %v757_v47 = vmax.f32 %v685_v44, 0.0  ;;  %v948_v51 = vadd.f32 %v1983_v43, %v756_v42 }
 0x1bc   :  { %v951_v50 = vadd.f32 %v1988_v40, %v759_v46 }
 0x1bd   :  { %v949_v52 = vadd.f32 %v1984_v45, %v757_v47 }
 0x1be   :  { %v983_v53 = vpack.c.bf16 %v951_v50, %v950_v49 }
 0x1bf   :  { %v982_v54 = vpack.c.bf16 %v949_v52, %v948_v51 }
 0x1c1   :  { %2447 = vmatprep.mubr.bf16.mxu1 %v982_v54 }
 0x1c2   :  { %2448 = vmatmul.mubr.bf16.gmra.mrb[60].mxu1 %v983_v53 }
 0x21d   :  { %v2389_v55 = vpop.f32.mrb[0].mxu1 }
 0x21e   :  { %v1089_v48 = vpop.f32.mrb[1].mxu1  ;;  %v1098_v58 = vadd.f32 %v2389_v55, %v2812_v56 }
 0x21f   :  { %v2390_v57 = vpop.f32.mrb[2].mxu1  ;;  %v1090_v61 = vadd.f32 %v2812_v56, %v1089_v48 }
 0x220   :  { %v1101_v59 = vadd.f32 %v2390_v57, %v2812_v56  ;;  %v1092_v60 = vpop.f32.mrb[3].mxu1 }
 0x221   :  { %v1093_v62 = vadd.f32 %v2812_v56, %v1092_v60 }
 0x222   :  { %v1997_v63 = vpack.c.bf16 %v1101_v59, %v1098_v58 }
 0x223   :  { %v1992_v0 = vpack.c.bf16 %v1093_v62, %v1090_v61 }
 0x224   :  { %2180 = vst [vmem:[#allocation10 + $0x8] sm:$0xff] %v1997_v63  }
 0x225   :  { %1993 = vst [vmem:[#allocation10] sm:$0xff] %v1992_v0   ;;  %v2393_v1 = vpop.f32.mrb[4].mxu1 }
 0x226   :  { %v1105_v2 = vpop.f32.mrb[5].mxu1  ;;  %v1114_v4 = vadd.f32 %v2393_v1, %v2812_v56 }
 0x227   :  { %v2394_v3 = vpop.f32.mrb[6].mxu1  ;;  %v1106_v7 = vadd.f32 %v2812_v56, %v1105_v2 }
 0x228   :  { %v1117_v5 = vadd.f32 %v2394_v3, %v2812_v56  ;;  %v1108_v6 = vpop.f32.mrb[7].mxu1 }
 0x229   :  { %v1109_v8 = vadd.f32 %v2812_v56, %v1108_v6 }
 0x22a   :  { %v2007_v9 = vpack.c.bf16 %v1117_v5, %v1114_v4 }
 0x22b   :  { %v2002_v10 = vpack.c.bf16 %v1109_v8, %v1106_v7 }
 0x22c   :  { %2182 = vst [vmem:[#allocation10 + $0x18] sm:$0xff] %v2007_v9  }
 0x22d   :  { %2181 = vst [vmem:[#allocation10 + $0x10] sm:$0xff] %v2002_v10   ;;  %v2397_v11 = vpop.f32.mrb[8].mxu1 }
 0x22e   :  { %v1121_v12 = vpop.f32.mrb[9].mxu1  ;;  %v1130_v14 = vadd.f32 %v2397_v11, %v2812_v56 }
 0x22f   :  { %v2398_v13 = vpop.f32.mrb[10].mxu1  ;;  %v1122_v17 = vadd.f32 %v2812_v56, %v1121_v12 }
 0x230   :  { %v1133_v15 = vadd.f32 %v2398_v13, %v2812_v56  ;;  %v1124_v16 = vpop.f32.mrb[11].mxu1 }
 0x231   :  { %v1125_v18 = vadd.f32 %v2812_v56, %v1124_v16 }
 0x232   :  { %v2017_v19 = vpack.c.bf16 %v1133_v15, %v1130_v14 }
 0x233   :  { %v2012_v20 = vpack.c.bf16 %v1125_v18, %v1122_v17 }
 0x234   :  { %2184 = vst [vmem:[#allocation10 + $0x28] sm:$0xff] %v2017_v19  }
 0x235   :  { %2183 = vst [vmem:[#allocation10 + $0x20] sm:$0xff] %v2012_v20   ;;  %v2401_v21 = vpop.f32.mrb[12].mxu1 }
 0x236   :  { %v1137_v22 = vpop.f32.mrb[13].mxu1  ;;  %v1146_v24 = vadd.f32 %v2401_v21, %v2812_v56 }
 0x237   :  { %v2402_v23 = vpop.f32.mrb[14].mxu1  ;;  %v1138_v27 = vadd.f32 %v2812_v56, %v1137_v22 }
 0x238   :  { %v1149_v25 = vadd.f32 %v2402_v23, %v2812_v56  ;;  %v1140_v26 = vpop.f32.mrb[15].mxu1 }
 0x239   :  { %v1141_v28 = vadd.f32 %v2812_v56, %v1140_v26 }
 0x23a   :  { %v2027_v29 = vpack.c.bf16 %v1149_v25, %v1146_v24 }
 0x23b   :  { %v2022_v30 = vpack.c.bf16 %v1141_v28, %v1138_v27 }
 0x23c   :  { %2186 = vst [vmem:[#allocation10 + $0x38] sm:$0xff] %v2027_v29  }
 0x23d   :  { %2185 = vst [vmem:[#allocation10 + $0x30] sm:$0xff] %v2022_v30   ;;  %v2405_v31 = vpop.f32.mrb[16].mxu1 }
 0x23e   :  { %v1153_v32 = vpop.f32.mrb[17].mxu1  ;;  %v1162_v34 = vadd.f32 %v2405_v31, %v2812_v56 }
 0x23f   :  { %v2406_v33 = vpop.f32.mrb[18].mxu1  ;;  %v1154_v37 = vadd.f32 %v2812_v56, %v1153_v32 }
 0x240   :  { %v1165_v35 = vadd.f32 %v2406_v33, %v2812_v56  ;;  %v1156_v36 = vpop.f32.mrb[19].mxu1 }
 0x241   :  { %v1157_v38 = vadd.f32 %v2812_v56, %v1156_v36 }
 0x242   :  { %v2037_v39 = vpack.c.bf16 %v1165_v35, %v1162_v34 }
 0x243   :  { %v2032_v40 = vpack.c.bf16 %v1157_v38, %v1154_v37 }
 0x244   :  { %2188 = vst [vmem:[#allocation10 + $0x48] sm:$0xff] %v2037_v39  }
 0x245   :  { %2187 = vst [vmem:[#allocation10 + $0x40] sm:$0xff] %v2032_v40   ;;  %v2409_v41 = vpop.f32.mrb[20].mxu1 }
 0x246   :  { %v1169_v42 = vpop.f32.mrb[21].mxu1  ;;  %v1178_v44 = vadd.f32 %v2409_v41, %v2812_v56 }
 0x247   :  { %v2410_v43 = vpop.f32.mrb[22].mxu1  ;;  %v1170_v47 = vadd.f32 %v2812_v56, %v1169_v42 }
 0x248   :  { %v1181_v45 = vadd.f32 %v2410_v43, %v2812_v56  ;;  %v1172_v46 = vpop.f32.mrb[23].mxu1 }
 0x249   :  { %v1173_v49 = vadd.f32 %v2812_v56, %v1172_v46 }
 0x24a   :  { %v2047_v50 = vpack.c.bf16 %v1181_v45, %v1178_v44 }
 0x24b   :  { %v2042_v51 = vpack.c.bf16 %v1173_v49, %v1170_v47 }
 0x24c   :  { %2190 = vst [vmem:[#allocation10 + $0x58] sm:$0xff] %v2047_v50  }
 0x24d   :  { %2189 = vst [vmem:[#allocation10 + $0x50] sm:$0xff] %v2042_v51   ;;  %v2413_v52 = vpop.f32.mrb[24].mxu1 }
 0x24e   :  { %v1185_v53 = vpop.f32.mrb[25].mxu1  ;;  %v1194_v55 = vadd.f32 %v2413_v52, %v2812_v56 }
 0x24f   :  { %v2414_v54 = vpop.f32.mrb[26].mxu1  ;;  %v1186_v58 = vadd.f32 %v2812_v56, %v1185_v53 }
 0x250   :  { %v1197_v48 = vadd.f32 %v2414_v54, %v2812_v56  ;;  %v1188_v57 = vpop.f32.mrb[27].mxu1 }
 0x251   :  { %v1189_v59 = vadd.f32 %v2812_v56, %v1188_v57 }
 0x252   :  { %v2057_v60 = vpack.c.bf16 %v1197_v48, %v1194_v55 }
 0x253   :  { %v2052_v61 = vpack.c.bf16 %v1189_v59, %v1186_v58 }
 0x254   :  { %2192 = vst [vmem:[#allocation10 + $0x68] sm:$0xff] %v2057_v60  }
 0x255   :  { %2191 = vst [vmem:[#allocation10 + $0x60] sm:$0xff] %v2052_v61   ;;  %v2417_v62 = vpop.f32.mrb[28].mxu1 }
 0x256   :  { %v1201_v63 = vpop.f32.mrb[29].mxu1  ;;  %v1210_v1 = vadd.f32 %v2417_v62, %v2812_v56 }
 0x257   :  { %v2418_v0 = vpop.f32.mrb[30].mxu1  ;;  %v1202_v4 = vadd.f32 %v2812_v56, %v1201_v63 }
 0x258   :  { %v1213_v2 = vadd.f32 %v2418_v0, %v2812_v56  ;;  %v1204_v3 = vpop.f32.mrb[31].mxu1 }
 0x259   :  { %v1205_v5 = vadd.f32 %v2812_v56, %v1204_v3 }
 0x25a   :  { %v2067_v6 = vpack.c.bf16 %v1213_v2, %v1210_v1 }
 0x25b   :  { %v2062_v7 = vpack.c.bf16 %v1205_v5, %v1202_v4 }
 0x25c   :  { %2194 = vst [vmem:[#allocation10 + $0x78] sm:$0xff] %v2067_v6  }
 0x25d   :  { %2193 = vst [vmem:[#allocation10 + $0x70] sm:$0xff] %v2062_v7   ;;  %v2421_v8 = vpop.f32.mrb[32].mxu1 }
 0x25e   :  { %v1217_v9 = vpop.f32.mrb[33].mxu1  ;;  %v1226_v11 = vadd.f32 %v2421_v8, %v2812_v56 }
 0x25f   :  { %v2422_v10 = vpop.f32.mrb[34].mxu1  ;;  %v1218_v14 = vadd.f32 %v2812_v56, %v1217_v9 }
 0x260   :  { %v1229_v12 = vadd.f32 %v2422_v10, %v2812_v56  ;;  %v1220_v13 = vpop.f32.mrb[35].mxu1 }
 0x261   :  { %v1221_v15 = vadd.f32 %v2812_v56, %v1220_v13 }
 0x262   :  { %v2077_v16 = vpack.c.bf16 %v1229_v12, %v1226_v11 }
 0x263   :  { %v2072_v17 = vpack.c.bf16 %v1221_v15, %v1218_v14 }
 0x264   :  { %2196 = vst [vmem:[#allocation10 + $0x88] sm:$0xff] %v2077_v16  }
 0x265   :  { %2195 = vst [vmem:[#allocation10 + $0x80] sm:$0xff] %v2072_v17   ;;  %v2425_v18 = vpop.f32.mrb[36].mxu1 }
 0x266   :  { %v1233_v19 = vpop.f32.mrb[37].mxu1  ;;  %v1242_v21 = vadd.f32 %v2425_v18, %v2812_v56 }
 0x267   :  { %v2426_v20 = vpop.f32.mrb[38].mxu1  ;;  %v1234_v24 = vadd.f32 %v2812_v56, %v1233_v19 }
 0x268   :  { %v1245_v22 = vadd.f32 %v2426_v20, %v2812_v56  ;;  %v1236_v23 = vpop.f32.mrb[39].mxu1 }
 0x269   :  { %v1237_v25 = vadd.f32 %v2812_v56, %v1236_v23 }
 0x26a   :  { %v2087_v26 = vpack.c.bf16 %v1245_v22, %v1242_v21 }
 0x26b   :  { %v2082_v27 = vpack.c.bf16 %v1237_v25, %v1234_v24 }
 0x26c   :  { %2198 = vst [vmem:[#allocation10 + $0x98] sm:$0xff] %v2087_v26  }
 0x26d   :  { %2197 = vst [vmem:[#allocation10 + $0x90] sm:$0xff] %v2082_v27   ;;  %v2429_v28 = vpop.f32.mrb[40].mxu1 }
 0x26e   :  { %v1249_v29 = vpop.f32.mrb[41].mxu1  ;;  %v1258_v31 = vadd.f32 %v2429_v28, %v2812_v56 }
 0x26f   :  { %v2430_v30 = vpop.f32.mrb[42].mxu1  ;;  %v1250_v34 = vadd.f32 %v2812_v56, %v1249_v29 }
 0x270   :  { %v1261_v32 = vadd.f32 %v2430_v30, %v2812_v56  ;;  %v1252_v33 = vpop.f32.mrb[43].mxu1 }
 0x271   :  { %v1253_v35 = vadd.f32 %v2812_v56, %v1252_v33 }
 0x272   :  { %v2097_v36 = vpack.c.bf16 %v1261_v32, %v1258_v31 }
 0x273   :  { %v2092_v37 = vpack.c.bf16 %v1253_v35, %v1250_v34 }
 0x274   :  { %2200 = vst [vmem:[#allocation10 + $0xa8] sm:$0xff] %v2097_v36  }
 0x275   :  { %2199 = vst [vmem:[#allocation10 + $0xa0] sm:$0xff] %v2092_v37   ;;  %v2433_v38 = vpop.f32.mrb[44].mxu1 }
 0x276   :  { %v1265_v39 = vpop.f32.mrb[45].mxu1  ;;  %v1274_v41 = vadd.f32 %v2433_v38, %v2812_v56 }
 0x277   :  { %v2434_v40 = vpop.f32.mrb[46].mxu1  ;;  %v1266_v44 = vadd.f32 %v2812_v56, %v1265_v39 }
 0x278   :  { %v1277_v42 = vadd.f32 %v2434_v40, %v2812_v56  ;;  %v1268_v43 = vpop.f32.mrb[47].mxu1 }
 0x279   :  { %v1269_v45 = vadd.f32 %v2812_v56, %v1268_v43 }
 0x27a   :  { %v2107_v46 = vpack.c.bf16 %v1277_v42, %v1274_v41 }
 0x27b   :  { %v2102_v47 = vpack.c.bf16 %v1269_v45, %v1266_v44 }
 0x27c   :  { %2202 = vst [vmem:[#allocation10 + $0xb8] sm:$0xff] %v2107_v46  }
 0x27d   :  { %2201 = vst [vmem:[#allocation10 + $0xb0] sm:$0xff] %v2102_v47   ;;  %v2437_v49 = vpop.f32.mrb[48].mxu1 }
 0x27e   :  { %v1281_v50 = vpop.f32.mrb[49].mxu1  ;;  %v1290_v52 = vadd.f32 %v2437_v49, %v2812_v56 }
 0x27f   :  { %v2438_v51 = vpop.f32.mrb[50].mxu1  ;;  %v1282_v55 = vadd.f32 %v2812_v56, %v1281_v50 }
 0x280   :  { %v1293_v53 = vadd.f32 %v2438_v51, %v2812_v56  ;;  %v1284_v54 = vpop.f32.mrb[51].mxu1 }
 0x281   :  { %v1285_v48 = vadd.f32 %v2812_v56, %v1284_v54 }
 0x282   :  { %v2117_v57 = vpack.c.bf16 %v1293_v53, %v1290_v52 }
 0x283   :  { %v2112_v58 = vpack.c.bf16 %v1285_v48, %v1282_v55 }
 0x284   :  { %2204 = vst [vmem:[#allocation10 + $0xc8] sm:$0xff] %v2117_v57  }
 0x285   :  { %2203 = vst [vmem:[#allocation10 + $0xc0] sm:$0xff] %v2112_v58   ;;  %v2441_v59 = vpop.f32.mrb[52].mxu1 }
 0x286   :  { %v1297_v60 = vpop.f32.mrb[53].mxu1  ;;  %v1306_v62 = vadd.f32 %v2441_v59, %v2812_v56 }
 0x287   :  { %v2442_v61 = vpop.f32.mrb[54].mxu1  ;;  %v1298_v1 = vadd.f32 %v2812_v56, %v1297_v60 }
 0x288   :  { %v1309_v63 = vadd.f32 %v2442_v61, %v2812_v56  ;;  %v1300_v0 = vpop.f32.mrb[55].mxu1 }
 0x289   :  { %v1301_v2 = vadd.f32 %v2812_v56, %v1300_v0 }
 0x28a   :  { %v2127_v3 = vpack.c.bf16 %v1309_v63, %v1306_v62 }
 0x28b   :  { %v2122_v4 = vpack.c.bf16 %v1301_v2, %v1298_v1 }
 0x28c   :  { %2206 = vst [vmem:[#allocation10 + $0xd8] sm:$0xff] %v2127_v3  }
 0x28d   :  { %2205 = vst [vmem:[#allocation10 + $0xd0] sm:$0xff] %v2122_v4   ;;  %v2445_v5 = vpop.f32.mrb[56].mxu1 }
 0x28e   :  { %v1313_v6 = vpop.f32.mrb[57].mxu1  ;;  %v1322_v8 = vadd.f32 %v2445_v5, %v2812_v56 }
 0x28f   :  { %v2446_v7 = vpop.f32.mrb[58].mxu1  ;;  %v1314_v11 = vadd.f32 %v2812_v56, %v1313_v6 }
 0x290   :  { %v1325_v9 = vadd.f32 %v2446_v7, %v2812_v56  ;;  %v1316_v10 = vpop.f32.mrb[59].mxu1 }
 0x291   :  { %v1317_v12 = vadd.f32 %v2812_v56, %v1316_v10 }
 0x292   :  { %v2137_v13 = vpack.c.bf16 %v1325_v9, %v1322_v8 }
 0x293   :  { %v2132_v14 = vpack.c.bf16 %v1317_v12, %v1314_v11 }
 0x294   :  { %2208 = vst [vmem:[#allocation10 + $0xe8] sm:$0xff] %v2137_v13  }
 0x295   :  { %2207 = vst [vmem:[#allocation10 + $0xe0] sm:$0xff] %v2132_v14   ;;  %v2449_v15 = vpop.f32.mrb[60].mxu1 }
 0x296   :  { %v1329_v16 = vpop.f32.mrb[61].mxu1  ;;  %v1338_v18 = vadd.f32 %v2449_v15, %v2812_v56 }
 0x297   :  { %v2450_v17 = vpop.f32.mrb[62].mxu1  ;;  %v1330_v21 = vadd.f32 %v2812_v56, %v1329_v16 }
 0x298   :  { %v1341_v19 = vadd.f32 %v2450_v17, %v2812_v56  ;;  %v1332_v20 = vpop.f32.mrb[63].mxu1 }
 0x299   :  { %v1333_v22 = vadd.f32 %v2812_v56, %v1332_v20 }
 0x29a   :  { %v2147_v23 = vpack.c.bf16 %v1341_v19, %v1338_v18 }
 0x29b   :  { %v2142_v24 = vpack.c.bf16 %v1333_v22, %v1330_v21 }
 0x29c   :  { %2210 = vst [vmem:[#allocation10 + $0xf8] sm:$0xff] %v2147_v23  }
 0x29d   :  { %2209 = vst [vmem:[#allocation10 + $0xf0] sm:$0xff] %v2142_v24  }
 0x29e   :  { %2605 = shalt.err (!%p2602_p8)
}
 0x29f   :  { %s2606_s28 = scalar_lea.hbm %s2899_s6, 4096 }
 0x2a0   :  { %p2607_p9 = scmp.ne.s32.totalorder %s2899_s6, %s2606_s28  ;;  %p2610_p10 = scmp.lt.u32.totalorder %s2606_s28, %s2899_s6 }
 0x2a2   :  { %p2612_p11 = pnand %p2610_p10, %p2607_p9 }
 0x2a4   :  { %2615 = shalt.err (!%p2612_p11)
}
 0x2a5   :  { %1675 = dma.vmem_to_hbm [thread:$0]  %s1670_s23, 4096, %s2899_s6, [#allocation4], %s2626_s9, %s2626_s9, %s2627_s10  }
 0x2a6   :  { %2622 = dma.done.wait [#allocation4], 4096  }
 0x2a7   :  { %2623 = vsyncadd [#allocation4], 4294963200 }
 0x2a8   :  { %1679 = vsyncpa [#allocation3], 1 }
 0x2a9   :  { %1680 = vsyncpa [#allocation6], 1 }
 0x2aa   :  { %1681 = vsyncpa [#allocation9], 1 }
 0x2ab   :  { %1682 = vsyncpa [#allocation4], 1 }

</bundles_post_ra>
